<compile_context>
chip_gen: v7x
topology: tpu7x:2x2x1
jax: 0.10.0
libtpu: 0.0.40
codegen_flags: <defaults>
</compile_context>

<pallas_src>
import jax
import jax.numpy as jnp
from jax.experimental import pallas as pl
from jax.experimental.pallas import tpu as pltpu


# --------------------------- Pallas kernel ---------------------------------
def _smaxpool_kernel(xw_ref, sw_ref, out_ref, snew_ref):
    # xw_ref, sw_ref, snew_ref: (K, T) blocks; out_ref: (1, T) block.
    x = xw_ref[...].astype(jnp.float32)                   # upcast: f32 accum
    s_new = sw_ref[...].astype(jnp.float32) + x           # fused sumspike += x
    snew_ref[...] = s_new.astype(snew_ref.dtype)          # in-place state out
    sw = s_new * 1000.0
    single = jnp.max(sw, axis=0, keepdims=True)            # MaxPool(s*1000)
    sps = jnp.max(x + sw, axis=0, keepdims=True)           # MaxPool(x + s*1000)
    out_ref[...] = (sps - single).astype(out_ref.dtype)


# --------------------------- layout helpers ---------------------------------
def _window_nchw(x, k):
    """NCHW -> (K, N*C*Ho*Wo) with minor axis in NCHW order."""
    N, C, H, W = x.shape
    Ho, Wo = H // k, W // k
    xw = x.reshape(N, C, Ho, k, Wo, k).transpose(3, 5, 0, 1, 2, 4)
    return xw.reshape(k * k, N * C * Ho * Wo)


def _unwindow_to_nchw(xw, nchw_shape, k):
    """Inverse of _window_nchw (used only for state inspection / testing)."""
    N, C, H, W = nchw_shape
    Ho, Wo = H // k, W // k
    v = xw.reshape(k, k, N, C, Ho, Wo).transpose(2, 3, 4, 0, 5, 1)
    return v.reshape(N, C, H, W)


def _pick_tile(M, max_elems):
    """Largest multiple of 128 that divides M and is <= max_elems."""
    if M % 128 != 0 or M <= 128:
        return M
    best, t = 128, 128
    while t <= min(M, max_elems):
        if M % t == 0:
            best = t
        t += 128
    return best


# --------------------------- public forward ---------------------------------
def smaxpool_init_state(x_shape, kernel_size=2, dtype=jnp.float32):
    """Zero sumspike state in the kernel's windowed, lane-dense layout."""
    N, C, H, W = x_shape
    k = kernel_size
    return jnp.zeros((k * k, N * C * (H // k) * (W // k)), dtype)


def smaxpool_forward(x, sumspike_w, kernel_size=2, stride=2, padding=0,
                     max_block_elems=64 * 1024):
    """One SMaxPool step. Returns (out_NCHW, new windowed sumspike state)."""
    assert stride == kernel_size and padding == 0, \
        "kernel supports non-overlapping, unpadded pooling (k == s, p == 0)"
    # TODO(synk): lateral_inhi=True (F.unfold-based) branch not implemented.
    N, C, H, W = x.shape
    k = kernel_size
    Ho, Wo = H // k, W // k
    K, M = k * k, N * C * Ho * Wo
    assert sumspike_w.shape == (K, M)

    xw = _window_nchw(x, k)                 # only remaining XLA glue pass
    T = _pick_tile(M, max_block_elems)
    grid = (M // T,)

    out2d, sumspike_new = pl.pallas_call(
        _smaxpool_kernel,
        out_shape=(jax.ShapeDtypeStruct((1, M), x.dtype),
                   jax.ShapeDtypeStruct((K, M), sumspike_w.dtype)),
        grid=grid,
        in_specs=[pl.BlockSpec((K, T), lambda i: (0, i)),
                  pl.BlockSpec((K, T), lambda i: (0, i))],
        out_specs=(pl.BlockSpec((1, T), lambda i: (0, i)),
                   pl.BlockSpec((K, T), lambda i: (0, i))),
        input_output_aliases={1: 1},        # sumspike updated in place
        compiler_params=pltpu.CompilerParams(
            dimension_semantics=("parallel",),
            vmem_limit_bytes=32 * 1024 * 1024),
    )(xw, sumspike_w)

    # Minor axis is already in NCHW order -> this reshape is free (no copy).
    out = out2d.reshape(N, C, Ho, Wo)
    return out, sumspike_new


# ---------------- pure-JAX reference for verification ----------------
def _maxpool_ref(x, k):
    N, C, H, W = x.shape
    return x.reshape(N, C, H // k, k, W // k, k).max(axis=(3, 5))


def smaxpool_ref(x, sumspike_prev, k=2):
    s = sumspike_prev + x
    single = _maxpool_ref(s * 1000.0, k)
    sps = _maxpool_ref(x + s * 1000.0, k)
    return sps - single, s


if __name__ == "__main__":
    N, C, H, W = 2, 4, 16, 16
    k = 2
    # Spike-like inputs (0/1), as SMaxPool is used on spiking activations.
    x1 = (jax.random.uniform(jax.random.PRNGKey(0), (N, C, H, W)) > 0.5
          ).astype(jnp.float32)
    x2 = (jax.random.uniform(jax.random.PRNGKey(1), (N, C, H, W)) > 0.5
          ).astype(jnp.float32)

    # Two timesteps: exercises the fused state update + in-place aliasing.
    # max_block_elems=256 forces a 2-point grid on this tiny example to
    # exercise the tiled / multi-block path.
    state = smaxpool_init_state((N, C, H, W), kernel_size=k)
    out1, state = smaxpool_forward(x1, state, kernel_size=k, stride=k,
                                   padding=0, max_block_elems=256)
    out2, state = smaxpool_forward(x2, state, kernel_size=k, stride=k,
                                   padding=0, max_block_elems=256)
    out2 = jax.block_until_ready(out2)

    # Reference
    s_ref = jnp.zeros((N, C, H, W), jnp.float32)
    o1_ref, s_ref = smaxpool_ref(x1, s_ref, k)
    o2_ref, s_ref = smaxpool_ref(x2, s_ref, k)

    assert out1.shape == (N, C, H // k, W // k)
    assert jnp.allclose(out1, o1_ref, atol=1e-4), "step-1 mismatch vs reference"
    assert jnp.allclose(out2, o2_ref, atol=1e-4), "step-2 mismatch vs reference"
    state_nchw = _unwindow_to_nchw(state, (N, C, H, W), k)
    assert jnp.allclose(state_nchw, s_ref, atol=1e-4), "state mismatch vs reference"

    print("KERNEL_OK")
</pallas_src>

<mosaic_0001>
module attributes {stable_mosaic.version = 11 : i64} {
  func.func @_smaxpool_kernel(%arg0: i32, %arg1: memref<4x256xf32, #tpu.memory_space<vmem>>, %arg2: memref<4x256xf32, #tpu.memory_space<vmem>>, %arg3: memref<1x256xf32, #tpu.memory_space<vmem>>, %arg4: memref<4x256xf32, #tpu.memory_space<vmem>>) attributes {dimension_semantics = [#tpu.dimension_semantics<parallel>], iteration_bounds = array<i64: 2>, scalar_prefetch = 0 : i64, scratch_operands = 0 : i64, tpu.core_type = #tpu.core_type<tc>, window_params = [{transform_indices = @transform_0, window_bounds = array<i64: 4, 256>}, {transform_indices = @transform_1, window_bounds = array<i64: 4, 256>}, {transform_indices = @transform_2, window_bounds = array<i64: 1, 256>}, {transform_indices = @transform_3, window_bounds = array<i64: 4, 256>}]} {
    %c0 = arith.constant 0 : index
    %c0_0 = arith.constant 0 : index
    %0 = vector.load %arg1[%c0, %c0_0] : memref<4x256xf32, #tpu.memory_space<vmem>>, vector<4x256xf32>
    %c0_1 = arith.constant 0 : index
    %c0_2 = arith.constant 0 : index
    %1 = vector.load %arg2[%c0_1, %c0_2] : memref<4x256xf32, #tpu.memory_space<vmem>>, vector<4x256xf32>
    %2 = arith.addf %1, %0 : vector<4x256xf32>
    %c0_3 = arith.constant 0 : index
    %c0_4 = arith.constant 0 : index
    %3 = vector.load %arg4[%c0_3, %c0_4] : memref<4x256xf32, #tpu.memory_space<vmem>>, vector<4x256xf32>
    tpu.vector_store %arg4[%c0_3, %c0_4], %2 {strides = array<i32>} : memref<4x256xf32, #tpu.memory_space<vmem>>, vector<4x256xf32>,
    %cst = arith.constant 1.000000e+03 : f32
    %4 = vector.broadcast %cst : f32 to vector<4x256xf32>
    %5 = arith.mulf %2, %4 : vector<4x256xf32>
    %cst_5 = arith.constant dense<0xFF800000> : vector<256xf32>
    %6 = vector.multi_reduction <maximumf>, %5, %cst_5 [0] : vector<4x256xf32> to vector<256xf32>
    %7 = vector.shape_cast %6 : vector<256xf32> to vector<1x256xf32>
    %8 = arith.addf %0, %5 : vector<4x256xf32>
    %cst_6 = arith.constant dense<0xFF800000> : vector<256xf32>
    %9 = vector.multi_reduction <maximumf>, %8, %cst_6 [0] : vector<4x256xf32> to vector<256xf32>
    %10 = vector.shape_cast %9 : vector<256xf32> to vector<1x256xf32>
    %11 = arith.subf %10, %7 : vector<1x256xf32>
    %c0_7 = arith.constant 0 : index
    %c0_8 = arith.constant 0 : index
    %12 = vector.load %arg3[%c0_7, %c0_8] : memref<1x256xf32, #tpu.memory_space<vmem>>, vector<1x256xf32>
    tpu.vector_store %arg3[%c0_7, %c0_8], %11 {strides = array<i32>} : memref<1x256xf32, #tpu.memory_space<vmem>>, vector<1x256xf32>,
    return
  }
  func.func @transform_0(%arg0: i32) -> (i32, i32) {
    %c0_i32 = arith.constant 0 : i32
    %c0_i32_0 = arith.constant 0 : i32
    return %c0_i32, %arg0 : i32, i32
  }
  func.func @transform_1(%arg0: i32) -> (i32, i32) {
    %c0_i32 = arith.constant 0 : i32
    %c0_i32_0 = arith.constant 0 : i32
    return %c0_i32, %arg0 : i32, i32
  }
  func.func @transform_2(%arg0: i32) -> (i32, i32) {
    %c0_i32 = arith.constant 0 : i32
    %c0_i32_0 = arith.constant 0 : i32
    return %c0_i32, %arg0 : i32, i32
  }
  func.func @transform_3(%arg0: i32) -> (i32, i32) {
    %c0_i32 = arith.constant 0 : i32
    %c0_i32_0 = arith.constant 0 : i32
    return %c0_i32, %arg0 : i32, i32
  }
}

</mosaic_0001>

<bundles_post_ra>
// kernel: tpu_custom_call.1
= control target key start
LH: loop header
LB: loop body
LE: loop exit
PB: predicated region body
PF: predicated region fallthrough
CT: control target
= control target key end

     0   :  { %9 = vsyncpa [#allocation3], 0  ;;  %s866_s0 = inlined_call_operand.vmem [shape: f32[4,512], index: 0, kind: input, shape index: {}]   ;;  %s867_s1 = inlined_call_operand.hbm [shape: f32[4,512], index: 1, kind: input, shape index: {}, may-alias: {1,3}]   ;;  %s868_s2 = inlined_call_operand.hbm [shape: f32[1,512], index: 2, kind: output, shape index: {0}]   ;;  %s869_s3 = inlined_call_operand.hbm [shape: f32[4,512], index: 3, kind: output, shape index: {1}, may-alias: {1,3}]  }
   0x1   :  { %11 = vsyncpa [#allocation3 + $0x1], 0 }
   0x2   :  { %12 = vsyncpa [#allocation4], 0 }
   0x3   :  { %14 = vsyncpa [#allocation4 + $0x1], 0 }
   0x4   :  { %15 = vsyncpa [#allocation7], 0 }
   0x5   :  { %17 = vsyncpa [#allocation7 + $0x1], 0  ;;  %s666_s12 = smov 0   ;;  %s668_s13 = smov 0  }
   0x6   :  { %s670_s14 = smov 0   ;;  %s672_s15 = smov 0  }
   0x7 LB: > { %s687_s16 = sadd.s32 4294967295, %s640_s15   ;;  %s437_s17 = sadd.s32 4294967294, %s640_s15   ;;  %s640_s15 = sphi %s672_s15, %s884_s15   ;;  %s636_s14 = sphi %s670_s14, %s883_s14   ;;  %s632_s13 = sphi %s668_s13, %s882_s13   ;;  %s628_s12 = sphi %s666_s12, %s881_s12  }
   0x8   : > { %s691_s18 = sadd.s32 1, %s640_s15   ;;  %s56_s19 = sadd.s32 1, %s636_s14 }
   0x9   : > { %s53_s20 = ssub.s32 %s640_s15, %s691_s18  ;;  %p63_p0 = scmp.ne.s32.totalorder %s636_s14, %s632_s13 }
   0xa   : > { %p54_p1 = scmp.eq.s32.totalorder %s53_s20, 0  ;;  %p64_p2 = scmp.eq.s32.totalorder %s640_s15, 0 }
   0xb   : > { %p69_p3 = scmp.ne.s32.totalorder %s632_s13, %s628_s12  ;;  %p70_p4 = scmp.eq.s32.totalorder %s687_s16, 0 }
   0xc   : > { %s703_s21 = scalar_select %p54_p1, %s636_s14, %s56_s19  }
   0xd   : > { %p705_p5 = por %p64_p2, %p63_p0  ;;  %p709_p6 = por %p70_p4, %p69_p3 }
   0xe   : > { %p93_p7 = scmp.eq.s32.totalorder %s687_s16, 1  ;;  %p99_p8 = scmp.eq.s32.totalorder %s437_s17, 1 }
   0xf   : > { %p477_p10 = scmp.lt.s32.totalorder %s640_s15, 2  ;;  %s154_s26 = sand.u32 1, %s636_s14  }
  0x10   : > { %p716_p11 = por %p93_p7, %p63_p0  ;;  %p720_p12 = por %p99_p8, %p69_p3 }
  0x11   : > { %s457_s27 = sshll.u32 %s640_s15, 7  ;;  %s440_s28 = sshll.u32 %s154_s26, 3 }
  0x12   : > { %s873_s24 = scalar_select %p716_p11, 1, 0 }
  0x13   : > { %s874_s25 = scalar_select %p720_p12, 1, 0 }
  0x14   : > { %s729_s4 = scalar_lea.hbm %s867_s1, %s457_s27  ;;  %s158_s5 = scalar_lea.vmem [#allocation2], %s440_s28 }
  0x15   : > { %s166_s6 = sshll.u32 %s158_s5, 4  ;;  %p733_p13 = pnand %p477_p10, %p705_p5  ;;  %s737_s6 = int_to_ptr.vmem [resolvable:$true] %s166_s6 }
  0x16   : > { %s155_s8 = scalar_lea.sflag [#allocation3], %s154_s26  ;;  %s512_s9 = scalar_lea.hbm %s729_s4, 128 }
  0x17   : > { %p513_p2 = scmp.ne.s32.totalorder %s729_s4, %s512_s9  ;;  %p514_p3 = pneg %p733_p13 }
  0x18   : > { %s517_s17 = scalar_lea.hbm %s867_s1, 256  ;;  %p518_p5 = scmp.lt.u32.totalorder %s729_s4, %s867_s1 }
  0x19   : > { %p515_p4 = pnand %p514_p3, %p513_p2  ;;  %p519_p8 = scmp.lt.u32.totalorder %s517_s17, %s512_s9 }
  0x1a   : > { %p521_p9 = scmp.lt.u32.totalorder %s512_s9, %s729_s4 }
  0x1b   : > { %p516_p7 = pneg %p515_p4  ;;  %p520_p10 = por %p519_p8, %p518_p5 }
  0x1d   : > { %p522_p0 = por %p521_p9, %p520_p10 }
  0x1f   : > { %p523_p1 = pnand %p522_p0, %p516_p7 }
  0x21   : > { %526 = shalt.err (!%p523_p1)
}
  0x22   : > { %s527_s22 = scalar_lea.vmem %s737_s6, 128  ;;  %s642_s26 = smov [#allocation2]  }
  0x23   : > { %p528_p2 = scmp.ne.s32.totalorder %s737_s6, %s527_s22  ;;  %s532_s27 = sshll.u32 %s642_s26, 4  ;;  %s533_s27 = int_to_ptr.vmem [resolvable:$false] %s532_s27 }
  0x24   : > { %s534_s28 = scalar_lea.vmem %s533_s27, 256  ;;  %p535_p11 = scmp.lt.s32.totalorder %s737_s6, %s533_s27 }
  0x25   : > { %p530_p4 = pnand %p528_p2, %p514_p3  ;;  %p536_p5 = scmp.lt.s32.totalorder %s534_s28, %s527_s22 }
  0x27   : > { %p531_p12 = pneg %p530_p4  ;;  %p537_p8 = por %p536_p5, %p535_p11 }
  0x29   : > { %p538_p9 = pnand %p537_p8, %p531_p12 }
  0x2b   : > { %541 = shalt.err (!%p538_p9)
}
  0x2c   : > { %469 = dma.hbm_to_vmem [thread:$0]  (!%p733_p13), %s729_s4, 128, %s737_s6, %s155_s8  }
  0x2d   : > { %p876_p0 = scmp.lt.s32.totalorder %s640_s15, 3  ;;  %p877_p1 = scmp.ge.s32.totalorder %s640_s15, 1 }
  0x2f   : > { %p172_p3 = pnand %p877_p1, %p876_p0 }
  0x30   : > { %s771_s29 = sand.u32 (!%p172_p3), 1, %s632_s13  }
  0x31   : > { %175 = sbr.rel (%p172_p3) target bundleno = 123 (0x7b), region = 28  ;;  %s444_s30 = sshll.u32 (!%p172_p3), %s771_s29, 3 }
  0x32   : > { %s178_s5 = scalar_lea.sflag (!%p172_p3), [#allocation3], %s771_s29  ;;  %s181_s9 = scalar_lea.vmem (!%p172_p3), [#allocation2], %s444_s30 }
  0x38   : > { %615 = dma.done.wait (%p709_p6), %s178_s5, 128  }
  0x39   : > { %617 = vsyncadd (%p709_p6), %s178_s5, 4294967168  ;;  %s447_s4 = sshll.u32 %s687_s16, 1  ;;  %s213_s6 = scalar_lea.vmem [#allocation6], %s444_s30  ;;  %v224_v1 = vld [vmem:[%s181_s9] sm:$0xff]  ;;  %vm231_vm0 = vcmask 1043456  }
  0x3a   : > { %p215_p11 = scmp.lt.s32.totalorder %s447_s4, 3  ;;  %s323_s7 = sshll.u32 %s213_s6, 4  ;;  %s783_s7 = int_to_ptr.vmem [resolvable:$true] %s323_s7 }
  0x3b   : > { %s459_s23 = sshll.u32 %s687_s16, 7  ;;  %s295_s26 = scalar_lea.sflag [#allocation7], %s771_s29 }
  0x3c   : > { %s886_s4 = smov (!%p215_p11, %s447_s4), 3  ;;  %s789_s22 = scalar_lea.hbm %s869_s3, %s459_s23 }
  0x3d   : > { %s448_s8 = sshll.u32 %s886_s4, 2  ;;  %s542_s27 = scalar_lea.vmem %s783_s7, 128 }
  0x3e   : > { %s218_s17 = scalar_lea.vmem %s866_s0, %s448_s8  ;;  %p543_p6 = scmp.ne.s32.totalorder %s783_s7, %s542_s27 }
  0x3f   : > { %v223_v0 = vld [vmem:[%s218_s17] sm:$0xff]  ;;  %p878_p12 = scmp.ne.s32.totalorder %s873_s24, 0  ;;  %s643_s28 = smov [#allocation6]  }
  0x40   : > { %v225_v2 = vadd.f32 %v224_v1, %v223_v0  ;;  %s546_s30 = sshll.u32 %s643_s28, 4  ;;  %s547_s30 = int_to_ptr.vmem [resolvable:$false] %s546_s30 }
  0x41   : > { %p544_p13 = pnand %p543_p6, %p878_p12  ;;  %s548_s5 = scalar_lea.vmem %s547_s30, 256 }
  0x42   : > { %226 = vst [vmem:[%s213_s6] sm:$0xff] %v225_v2  ;;  %v227_v3 = vmul.f32 1000.0, %v225_v2  ;;  %p549_p10 = scmp.lt.s32.totalorder %s783_s7, %s547_s30  ;;  %p550_p2 = scmp.lt.s32.totalorder %s548_s5, %s542_s27 }
  0x43   : > { %p545_p7 = pneg %p544_p13 }
  0x44   : > { %p551_p4 = por %p550_p2, %p549_p10 }
  0x46   : > { %p552_p5 = pnand %p551_p4, %p545_p7 }
  0x48   : > { %555 = shalt.err (!%p552_p5)
}
  0x49   : > { %s556_s9 = scalar_lea.hbm %s789_s22, 128  ;;  %s560_s8 = scalar_lea.hbm %s869_s3, 256 }
  0x4a   : > { %p557_p8 = scmp.ne.s32.totalorder %s789_s22, %s556_s9  ;;  %p561_p1 = scmp.lt.u32.totalorder %s789_s22, %s869_s3 }
  0x4b   : > { %p562_p3 = scmp.lt.u32.totalorder %s560_s8, %s556_s9  ;;  %p564_p6 = scmp.lt.u32.totalorder %s556_s9, %s789_s22 }
  0x4c   : > { %p558_p9 = pnand %p557_p8, %p878_p12 }
  0x4d   : > { %p563_p11 = por %p562_p3, %p561_p1 }
  0x4e   : > { %p559_p0 = pneg %p558_p9 }
  0x4f   : > { %p565_p13 = por %p564_p6, %p563_p11 }
  0x51   : > { %p566_p7 = pnand %p565_p13, %p559_p0 }
  0x53   : > { %569 = shalt.err (!%p566_p7)
}
  0x54   : > { %463 = dma.vmem_to_hbm [thread:$0]  (%p878_p12), %s783_s7, 128, %s789_s22, %s295_s26   ;;  %v229_v4 = vcombine.high %v227_v3, %v227_v3  ;;  %v232_v5 = vsel %vm231_vm0, %v227_v3, -inf  ;;  %v246_v6 = vadd.f32 %v227_v3, %v223_v0  ;;  %v644_v23 = vmov 1966171168  }
  0x55   : > { %v233_v7 = vrot.slane %v232_v5, 4  ;;  %v270_v24 = vunpack.c.l.s4 %v644_v23  ;;  %v272_v25 = vlaneseq  ;;  %s445_s7 = sshll.u32 %s771_s29, 1  ;;  %s458_s19 = sshll.u32 %s687_s16, 5 }
  0x56   : > { %v239_v8 = vsel %vm231_vm0, %v229_v4, -inf  ;;  %v248_v9 = vcombine.high %v246_v6, %v246_v6  ;;  %v250_v10 = vsel %vm231_vm0, %v246_v6, -inf  ;;  %s206_s17 = scalar_lea.vmem [#allocation5], %s445_s7  ;;  %s824_s26 = scalar_lea.hbm %s868_s2, %s458_s19 }
  0x57   : > { %v234_v11 = vmax.f32 %v232_v5, %v233_v7  ;;  %v240_v12 = vrot.slane %v239_v8, 4  ;;  %v251_v13 = vrot.slane %v250_v10, 4  ;;  %v273_v34 = vshrl.u32 %v272_v25, 7  ;;  %s309_s23 = sshll.u32 %s206_s17, 4  ;;  %s290_s27 = scalar_lea.sflag [#allocation4], %s771_s29  ;;  %s819_s23 = int_to_ptr.vmem [resolvable:$true] %s309_s23 }
  0x58   : > { %v257_v14 = vsel %vm231_vm0, %v248_v9, -inf  ;;  %v271_v38 = vunpack.c.0.s8 %v270_v24  ;;  %vm286_vm1 = vcmp.lt.s32.totalorder %v272_v25, 256  ;;  %s570_s28 = scalar_lea.vmem %s819_s23, 32  ;;  %s645_s16 = smov [#allocation5]  }
  0x59   : > { %v235_v15 = vrot.slane %v234_v11, 2  ;;  %v241_v16 = vmax.f32 %v239_v8, %v240_v12  ;;  %v252_v17 = vmax.f32 %v250_v10, %v251_v13  ;;  %v258_v18 = vrot.slane %v257_v14, 4  ;;  %p571_p10 = scmp.ne.s32.totalorder %s819_s23, %s570_s28  ;;  %s574_s30 = sshll.u32 %s645_s16, 4  ;;  %s575_s30 = int_to_ptr.vmem [resolvable:$false] %s574_s30 }
  0x5a   : > { %v274_v42 = vsub.s32 %v271_v38, %v273_v34  ;;  %s576_s5 = scalar_lea.vmem %s575_s30, 64  ;;  %p577_p5 = scmp.lt.s32.totalorder %s819_s23, %s575_s30 }
  0x5b   : > { %v236_v19 = vmax.f32 %v234_v11, %v235_v15  ;;  %v242_v20 = vrot.slane %v241_v16, 2  ;;  %v253_v21 = vrot.slane %v252_v17, 2  ;;  %v259_v22 = vmax.f32 %v257_v14, %v258_v18  ;;  %p572_p2 = pnand %p571_p10, %p878_p12  ;;  %p578_p8 = scmp.lt.s32.totalorder %s576_s5, %s570_s28 }
  0x5d   : > { %v237_v26 = vrot.slane %v236_v19, 1  ;;  %v243_v27 = vmax.f32 %v241_v16, %v242_v20  ;;  %v254_v28 = vmax.f32 %v252_v17, %v253_v21  ;;  %v260_v29 = vrot.slane %v259_v22, 2  ;;  %p573_p4 = pneg %p572_p2  ;;  %p579_p9 = por %p578_p8, %p577_p5 }
  0x5f   : > { %v255_v30 = vrot.slane %v254_v28, 1  ;;  %v261_v31 = vmax.f32 %v259_v22, %v260_v29  ;;  %v238_v32 = vmax.f32 %v236_v19, %v237_v26  ;;  %v244_v33 = vrot.slane %v243_v27, 1  ;;  %p580_p0 = pnand %p579_p9, %p573_p4 }
  0x61   : > { %v256_v35 = vmax.f32 %v254_v28, %v255_v30  ;;  %v262_v36 = vrot.slane %v261_v31, 1  ;;  %v245_v37 = vmax.f32 %v243_v27, %v244_v33 }
  0x63   : > { %v263_v39 = vmax.f32 %v261_v31, %v262_v36  ;;  %v264_v40 = vsub.f32 %v256_v35, %v238_v32 }
  0x65   : > { %v265_v41 = vsub.f32 %v263_v39, %v245_v37 }
  0x67   : > { %v268_v43 = vcombine.low %v264_v40, %v265_v41 }
  0x69   : > { %v275_v44 = vrot.slane %v268_v43, %v274_v42 }
  0x6b   : > { %v282_v45 = vrot.slane %v275_v44, %v274_v42 }
  0x6d   : > { %288 = vst.msk [vmem:[%s206_s17] sm:$0x3] %vm286_vm1, %v282_v45 }
  0x6e   : > { %583 = shalt.err (!%p580_p0)
}
  0x6f   : > { %s584_s29 = scalar_lea.hbm %s824_s26, 32  ;;  %s588_s6 = scalar_lea.hbm %s868_s2, 64 }
  0x70   : > { %p585_p1 = scmp.ne.s32.totalorder %s824_s26, %s584_s29  ;;  %p589_p6 = scmp.lt.u32.totalorder %s824_s26, %s868_s2 }
  0x71   : > { %p590_p13 = scmp.lt.u32.totalorder %s588_s6, %s584_s29  ;;  %p592_p10 = scmp.lt.u32.totalorder %s584_s29, %s824_s26 }
  0x72   : > { %p586_p3 = pnand %p585_p1, %p878_p12 }
  0x73   : > { %p591_p7 = por %p590_p13, %p589_p6 }
  0x74   : > { %p587_p11 = pneg %p586_p3 }
  0x75   : > { %p593_p2 = por %p592_p10, %p591_p7 }
  0x77   : > { %p594_p4 = pnand %p593_p2, %p587_p11 }
  0x79   : > { %597 = shalt.err (!%p594_p4)
}
  0x7a   : > { %462 = dma.vmem_to_hbm [thread:$0]  (%p878_p12), %s819_s23, 32, %s824_s26, %s290_s27  }
  0x7b PF: > { %s335_s11 = sand.u32 1, %s628_s12   ;;  %p879_p5 = scmp.ne.s32.totalorder %s874_s25, 0 }
  0x7c   : > { %p880_p8 = scmp.ge.s32.totalorder %s640_s15, 2  ;;  %s336_s7 = scalar_lea.sflag [#allocation4], %s335_s11 }
  0x7e   : > { %p471_p9 = pnand %p880_p8, %p879_p5 }
  0x80   : > { %619 = dma.done.wait (!%p471_p9), %s336_s7, 32  }
  0x81   : > { %621 = vsyncadd (!%p471_p9), %s336_s7, 4294967264  ;;  %s345_s17 = scalar_lea.sflag [#allocation7], %s335_s11 }
  0x82   : > { %623 = dma.done.wait (!%p471_p9), %s345_s17, 128  }
  0x83   : > { %625 = vsyncadd (!%p471_p9), %s345_s17, 4294967168  ;;  %p20_p12 = scmp.ge.s32.totalorder %s691_s18, 4   ;;  %s881_s12 = smov %s632_s13 }
  0x84   : > { %s882_s13 = smov %s636_s14  ;;  %s883_s14 = smov %s703_s21 }
  0x85   : > { %s884_s15 = smov %s691_s18  ;;  %22 = sbr.rel (!%p20_p12) target bundleno = 7 (0x7), region = 93 }
  0x8c   :  { %350 = vsyncpa [#allocation3], 1 }
  0x8d   :  { %352 = vsyncpa [#allocation3 + $0x1], 1 }
  0x8e   :  { %353 = vsyncpa [#allocation4], 1 }
  0x8f   :  { %355 = vsyncpa [#allocation4 + $0x1], 1 }
  0x90   :  { %356 = vsyncpa [#allocation7], 1 }
  0x91   :  { %358 = vsyncpa [#allocation7 + $0x1], 1 }

</bundles_post_ra>
